<compile_context>
chip_gen: v6e
topology: v6e:2x2x1
jax: 0.10.0
libtpu: 0.0.40
codegen_flags: <defaults>
</compile_context>

<pallas_src>
import functools

import jax
import jax.numpy as jnp
from jax.experimental import pallas as pl
from jax.experimental.pallas import tpu as pltpu


_SCALE = 20.0          # the module's forward hard-codes `* 20` (ignores self.scale)
_DIAG_PENALTY = 1e12   # torch.eye(...) * 1e12 subtraction
_LOSS_SCALE = 0.02     # final `loss * 0.02`


def _simcse_kernel(f_row_ref, f_col_ref, loss_ref, m_scr, l_scr, pos_scr,
                   *, bsz, tm, tn, matmul_dtype):
    i = pl.program_id(0)            # row-tile index   (parallel axis)
    j = pl.program_id(1)            # column-tile index (LSE reduction axis)
    r0 = i * tm                     # first global row of this tile
    c0 = j * tn                     # first global column of this tile

    @pl.when(j == 0)
    def _init():
        m_scr[...] = jnp.full_like(m_scr, -jnp.inf)
        l_scr[...] = jnp.zeros_like(l_scr)
        pos_scr[...] = jnp.zeros_like(pos_scr)

    # --- L2 normalize both tiles: x * rsqrt(max(|x|^2, eps^2)) == x / max(|x|, eps)
    fr = f_row_ref[...].astype(jnp.float32)
    fc = f_col_ref[...].astype(jnp.float32)
    fr = fr * jax.lax.rsqrt(jnp.maximum(jnp.sum(fr * fr, axis=-1, keepdims=True), 1e-24))
    fc = fc * jax.lax.rsqrt(jnp.maximum(jnp.sum(fc * fc, axis=-1, keepdims=True), 1e-24))
    if matmul_dtype is not None:
        fr = fr.astype(matmul_dtype)
        fc = fc.astype(matmul_dtype)

    # --- similarity tile on the MXU; contract dim 1 of both operands (no fc.T)
    sim = jax.lax.dot_general(
        fr, fc, dimension_numbers=(((1,), (1,)), ((), ())),
        preferred_element_type=jnp.float32)                        # (tm, tn) f32
    s = sim * _SCALE

    row_g = r0 + jax.lax.broadcasted_iota(jnp.int32, (tm, 1), 0)   # global row ids
    col_g = c0 + jax.lax.broadcasted_iota(jnp.int32, (1, tn), 1)   # global col ids

    # --- positive-pair logit (one-hot labels): even row p -> col p//2 + bsz,
    #     odd row p -> col p//2.  Only column tiles that can contain a target
    #     do any (tm, tn) work.
    half = tm // 2
    q0 = i * half                                # == r0 // 2 (tm is even)
    odd_hit = jnp.logical_and(c0 < q0 + half, q0 < c0 + tn)                 # [q0, q0+half)
    even_hit = jnp.logical_and(c0 < q0 + half + bsz, q0 + bsz < c0 + tn)    # + bsz

    @pl.when(jnp.logical_or(odd_hit, even_hit))
    def _gather_pos():
        tgt = jnp.where((row_g & 1) == 0, (row_g >> 1) + bsz, row_g >> 1)   # (tm, 1)
        pos_scr[...] += jnp.sum(jnp.where(col_g == tgt, s, 0.0),
                                axis=-1, keepdims=True)

    # --- online log-sum-exp; diagonal -1e12 mask only on diagonal tiles (f32)
    def lse_update(s_tile):
        m_prev = m_scr[...]
        m_cur = jnp.maximum(m_prev, jnp.max(s_tile, axis=-1, keepdims=True))
        l_scr[...] = (jnp.exp(m_prev - m_cur) * l_scr[...]
                      + jnp.sum(jnp.exp(s_tile - m_cur), axis=-1, keepdims=True))
        m_scr[...] = m_cur

    on_diag = jnp.logical_and(r0 < c0 + tn, c0 < r0 + tm)

    @pl.when(on_diag)
    def _masked_update():
        lse_update(jnp.where(row_g == col_g, (sim - _DIAG_PENALTY) * _SCALE, s))

    @pl.when(jnp.logical_not(on_diag))
    def _plain_update():
        lse_update(s)

    # --- finalize: per-row soft-label cross entropy  loss_p = lse_p - s[p, tgt(p)]
    @pl.when(j == pl.num_programs(1) - 1)
    def _finalize():
        loss_ref[...] = m_scr[...] + jnp.log(l_scr[...]) - pos_scr[...]


def _pick_block(n, preferred=256):
    # 256-aligned fills v6e/v7x's 256^2 MXU; pass block_m=block_n=128 on v5e.
    for t in (preferred, 256, 128, 64, 32, 16, 8):
        if t <= n and n % t == 0:
            return t
    return n   # tiny / odd N: one full block (block == full array dim is legal)


def simcse_loss(feature_1, feature_2, *, block_m=None, block_n=None, matmul_dtype=None):
    assert feature_1.ndim == 2 and feature_1.shape == feature_2.shape
    bsz, d = feature_1.shape
    n = 2 * bsz

    # [f1; f2] like torch.concat (splitting it would double column-tile DMA).
    feat = jnp.concatenate([feature_1, feature_2], axis=0)

    # Lane-dense hidden dim (multiple of 128); zero padding is semantics-preserving.
    d_pad = max(128, ((d + 127) // 128) * 128)
    if d_pad != d:
        feat = jnp.pad(feat, ((0, 0), (0, d_pad - d)))

    tm = block_m or _pick_block(n)
    tn = block_n or _pick_block(n)

    kernel = functools.partial(_simcse_kernel, bsz=bsz, tm=tm, tn=tn,
                               matmul_dtype=matmul_dtype)

    per_row = pl.pallas_call(
        kernel,
        out_shape=jax.ShapeDtypeStruct((n, 1), jnp.float32),
        grid_spec=pltpu.PrefetchScalarGridSpec(
            num_scalar_prefetch=0,
            grid=(n // tm, n // tn),
            in_specs=[
                pl.BlockSpec((tm, d_pad), lambda i, j: (i, 0)),   # row tile
                pl.BlockSpec((tn, d_pad), lambda i, j: (j, 0)),   # column tile
            ],
            out_specs=pl.BlockSpec((tm, 1), lambda i, j: (i, 0)),
            scratch_shapes=[
                pltpu.VMEM((tm, 1), jnp.float32),   # running max
                pltpu.VMEM((tm, 1), jnp.float32),   # running sum-exp
                pltpu.VMEM((tm, 1), jnp.float32),   # positive-pair logit
            ],
        ),
        compiler_params=pltpu.CompilerParams(
            dimension_semantics=("parallel", "arbitrary")),
    )(feat, feat)

    # F.cross_entropy(..., reduction='mean') over the 2*bsz rows, then * 0.02.
    return jnp.mean(per_row) * jnp.float32(_LOSS_SCALE)


def _reference_loss(feature_1, feature_2):
    # Pure-JAX mirror of the PyTorch forward (f32 throughout).
    f = jnp.concatenate([feature_1, feature_2], axis=0).astype(jnp.float32)
    n = f.shape[0]
    bsz = n // 2
    fn = f * jax.lax.rsqrt(jnp.maximum(jnp.sum(f * f, axis=-1, keepdims=True), 1e-24))
    sim = jnp.dot(fn, fn.T, precision=jax.lax.Precision.HIGHEST)
    sim = (sim - jnp.eye(n, dtype=jnp.float32) * _DIAG_PENALTY) * _SCALE
    rows = jnp.arange(n)
    tgt = jnp.where(rows % 2 == 0, rows // 2 + bsz, rows // 2)
    labels = jax.nn.one_hot(tgt, n, dtype=jnp.float32)
    logp = jax.nn.log_softmax(sim, axis=-1)
    return -jnp.mean(jnp.sum(labels * logp, axis=-1)) * jnp.float32(_LOSS_SCALE)


if __name__ == "__main__":
    key = jax.random.PRNGKey(0)
    k1, k2, k3, k4 = jax.random.split(key, 4)

    # Small case consistent with the module: bsz=8, hidden=32 (grid = (1, 1)).
    f1 = jax.random.normal(k1, (8, 32), dtype=jnp.float32)
    f2 = jax.random.normal(k2, (8, 32), dtype=jnp.float32)
    loss = jax.block_until_ready(simcse_loss(f1, f2))
    ref = jax.block_until_ready(_reference_loss(f1, f2))
    assert jnp.allclose(loss, ref, rtol=2e-5, atol=2e-5), (loss, ref)

    # Larger case exercising the real tiled / flash-LSE path: N=512, grid=(4, 4).
    g1 = jax.random.normal(k3, (256, 256), dtype=jnp.float32)
    g2 = jax.random.normal(k4, (256, 256), dtype=jnp.float32)
    loss_big = jax.block_until_ready(simcse_loss(g1, g2, block_m=128, block_n=128))
    ref_big = jax.block_until_ready(_reference_loss(g1, g2))
    assert jnp.allclose(loss_big, ref_big, rtol=1e-4, atol=1e-4), (loss_big, ref_big)

    # Optional bf16 MXU operands (f32 accumulation + f32 softmax).
    loss_bf16 = jax.block_until_ready(
        simcse_loss(g1, g2, block_m=128, block_n=128, matmul_dtype=jnp.bfloat16))
    assert jnp.allclose(loss_bf16, ref_big, rtol=2e-2, atol=2e-2), (loss_bf16, ref_big)

    print("KERNEL_OK")
</pallas_src>

<mosaic_0001>
module attributes {stable_mosaic.version = 11 : i64} {
  func.func @_simcse_kernel(%arg0: i32, %arg1: i32, %arg2: memref<16x128xf32, #tpu.memory_space<vmem>>, %arg3: memref<16x128xf32, #tpu.memory_space<vmem>>, %arg4: memref<16x1xf32, #tpu.memory_space<vmem>>, %arg5: memref<16x1xf32, #tpu.memory_space<vmem>>, %arg6: memref<16x1xf32, #tpu.memory_space<vmem>>, %arg7: memref<16x1xf32, #tpu.memory_space<vmem>>) attributes {dimension_semantics = [#tpu.dimension_semantics<parallel>, #tpu.dimension_semantics<arbitrary>], iteration_bounds = array<i64: 1, 1>, scalar_prefetch = 0 : i64, scratch_operands = 3 : i64, tpu.core_type = #tpu.core_type<tc>, window_params = [{transform_indices = @transform_0, window_bounds = array<i64: 16, 128>}, {transform_indices = @transform_1, window_bounds = array<i64: 16, 128>}, {transform_indices = @transform_2, window_bounds = array<i64: 16, 1>}]} {
    %c16_i32 = arith.constant 16 : i32
    %0 = arith.muli %arg0, %c16_i32 : i32
    %c16_i32_0 = arith.constant 16 : i32
    %1 = arith.muli %arg1, %c16_i32_0 : i32
    %c0_i32 = arith.constant 0 : i32
    %2 = arith.cmpi eq, %arg1, %c0_i32 : i32
    %3 = arith.extui %2 : i1 to i32
    %c0_i32_1 = arith.constant 0 : i32
    %4 = arith.cmpi ne, %3, %c0_i32_1 : i32
    scf.if %4 {
      %cst_23 = arith.constant 0xFF800000 : f32
      %61 = vector.broadcast %cst_23 : f32 to vector<16x1xf32>
      %c0_24 = arith.constant 0 : index
      %c0_25 = arith.constant 0 : index
      %62 = vector.load %arg5[%c0_24, %c0_25] : memref<16x1xf32, #tpu.memory_space<vmem>>, vector<16x1xf32>
      tpu.vector_store %arg5[%c0_24, %c0_25], %61 {strides = array<i32>} : memref<16x1xf32, #tpu.memory_space<vmem>>, vector<16x1xf32>,
      %cst_26 = arith.constant 0.000000e+00 : f32
      %63 = vector.broadcast %cst_26 : f32 to vector<16x1xf32>
      %c0_27 = arith.constant 0 : index
      %c0_28 = arith.constant 0 : index
      %64 = vector.load %arg6[%c0_27, %c0_28] : memref<16x1xf32, #tpu.memory_space<vmem>>, vector<16x1xf32>
      tpu.vector_store %arg6[%c0_27, %c0_28], %63 {strides = array<i32>} : memref<16x1xf32, #tpu.memory_space<vmem>>, vector<16x1xf32>,
      %cst_29 = arith.constant 0.000000e+00 : f32
      %65 = vector.broadcast %cst_29 : f32 to vector<16x1xf32>
      %c0_30 = arith.constant 0 : index
      %c0_31 = arith.constant 0 : index
      %66 = vector.load %arg7[%c0_30, %c0_31] : memref<16x1xf32, #tpu.memory_space<vmem>>, vector<16x1xf32>
      tpu.vector_store %arg7[%c0_30, %c0_31], %65 {strides = array<i32>} : memref<16x1xf32, #tpu.memory_space<vmem>>, vector<16x1xf32>,
    } else {
    }
    %c0 = arith.constant 0 : index
    %c0_2 = arith.constant 0 : index
    %5 = vector.load %arg2[%c0, %c0_2] : memref<16x128xf32, #tpu.memory_space<vmem>>, vector<16x128xf32>
    %c0_3 = arith.constant 0 : index
    %c0_4 = arith.constant 0 : index
    %6 = vector.load %arg3[%c0_3, %c0_4] : memref<16x128xf32, #tpu.memory_space<vmem>>, vector<16x128xf32>
    %7 = arith.mulf %5, %5 : vector<16x128xf32>
    %cst = arith.constant dense<0.000000e+00> : vector<16xf32>
    %8 = vector.multi_reduction <add>, %7, %cst [1] : vector<16x128xf32> to vector<16xf32>
    %9 = vector.shape_cast %8 : vector<16xf32> to vector<16x1xf32>
    %cst_5 = arith.constant 1.000000e-24 : f32
    %10 = vector.broadcast %cst_5 : f32 to vector<16x1xf32>
    %11 = arith.maximumf %9, %10 : vector<16x1xf32>
    %12 = math.rsqrt %11 : vector<16x1xf32>
    %13 = vector.broadcast %12 : vector<16x1xf32> to vector<16x128xf32>
    %14 = arith.mulf %5, %13 : vector<16x128xf32>
    %15 = arith.mulf %6, %6 : vector<16x128xf32>
    %cst_6 = arith.constant dense<0.000000e+00> : vector<16xf32>
    %16 = vector.multi_reduction <add>, %15, %cst_6 [1] : vector<16x128xf32> to vector<16xf32>
    %17 = vector.shape_cast %16 : vector<16xf32> to vector<16x1xf32>
    %cst_7 = arith.constant 1.000000e-24 : f32
    %18 = vector.broadcast %cst_7 : f32 to vector<16x1xf32>
    %19 = arith.maximumf %17, %18 : vector<16x1xf32>
    %20 = math.rsqrt %19 : vector<16x1xf32>
    %21 = vector.broadcast %20 : vector<16x1xf32> to vector<16x128xf32>
    %22 = arith.mulf %6, %21 : vector<16x128xf32>
    %cst_8 = arith.constant dense<0.000000e+00> : vector<16x16xf32>
    %23 = tpu.matmul %14, %22, %cst_8 {dimension_numbers = #tpu.dot_dimension_numbers<[1], [1], [0], [0], [0, 0, 1, 0], [], []>} : vector<16x128xf32>, vector<16x128xf32>, vector<16x16xf32> -> vector<16x16xf32>
    %cst_9 = arith.constant 2.000000e+01 : f32
    %24 = vector.broadcast %cst_9 : f32 to vector<16x16xf32>
    %25 = arith.mulf %23, %24 : vector<16x16xf32>
    %26 = tpu.iota {dimensions = array<i32: 0>} : vector<16x1xi32>
    %27 = vector.broadcast %0 : i32 to vector<16x1xi32>
    %28 = arith.addi %27, %26 : vector<16x1xi32>
    %29 = tpu.iota {dimensions = array<i32: 1>} : vector<1x16xi32>
    %30 = vector.broadcast %1 : i32 to vector<1x16xi32>
    %31 = arith.addi %30, %29 : vector<1x16xi32>
    %c8_i32 = arith.constant 8 : i32
    %32 = arith.muli %arg0, %c8_i32 : i32
    %c8_i32_10 = arith.constant 8 : i32
    %33 = arith.addi %32, %c8_i32_10 : i32
    %34 = arith.cmpi slt, %1, %33 : i32
    %c16_i32_11 = arith.constant 16 : i32
    %35 = arith.addi %1, %c16_i32_11 : i32
    %36 = arith.cmpi slt, %32, %35 : i32
    %37 = arith.andi %34, %36 : i1
    %c8_i32_12 = arith.constant 8 : i32
    %38 = arith.addi %32, %c8_i32_12 : i32
    %c8_i32_13 = arith.constant 8 : i32
    %39 = arith.addi %38, %c8_i32_13 : i32
    %40 = arith.cmpi slt, %1, %39 : i32
    %c8_i32_14 = arith.constant 8 : i32
    %41 = arith.addi %32, %c8_i32_14 : i32
    %c16_i32_15 = arith.constant 16 : i32
    %42 = arith.addi %1, %c16_i32_15 : i32
    %43 = arith.cmpi slt, %41, %42 : i32
    %44 = arith.andi %40, %43 : i1
    %45 = arith.ori %37, %44 : i1
    %46 = arith.extui %45 : i1 to i32
    %c0_i32_16 = arith.constant 0 : i32
    %47 = arith.cmpi ne, %46, %c0_i32_16 : i32
    scf.if %47 {
      %c1_i32 = arith.constant 1 : i32
      %61 = vector.broadcast %c1_i32 : i32 to vector<16x1xi32>
      %62 = arith.andi %28, %61 : vector<16x1xi32>
      %c0_i32_23 = arith.constant 0 : i32
      %63 = vector.broadcast %c0_i32_23 : i32 to vector<16x1xi32>
      %64 = arith.cmpi eq, %62, %63 : vector<16x1xi32>
      %c1_i32_24 = arith.constant 1 : i32
      %65 = vector.broadcast %c1_i32_24 : i32 to vector<16x1xi32>
      %66 = arith.shrsi %28, %65 : vector<16x1xi32>
      %c8_i32_25 = arith.constant 8 : i32
      %67 = vector.broadcast %c8_i32_25 : i32 to vector<16x1xi32>
      %68 = arith.addi %66, %67 : vector<16x1xi32>
      %c1_i32_26 = arith.constant 1 : i32
      %69 = vector.broadcast %c1_i32_26 : i32 to vector<16x1xi32>
      %70 = arith.shrsi %28, %69 : vector<16x1xi32>
      %71 = arith.select %64, %68, %70 : vector<16x1xi1>, vector<16x1xi32>
      %c0_27 = arith.constant 0 : index
      %c0_28 = arith.constant 0 : index
      %72 = vector.load %arg7[%c0_27, %c0_28] : memref<16x1xf32, #tpu.memory_space<vmem>>, vector<16x1xf32>
      %73 = vector.broadcast %31 : vector<1x16xi32> to vector<16x16xi32>
      %74 = vector.broadcast %71 : vector<16x1xi32> to vector<16x16xi32>
      %75 = arith.cmpi eq, %73, %74 : vector<16x16xi32>
      %cst_29 = arith.constant 0.000000e+00 : f32
      %76 = vector.broadcast %cst_29 : f32 to vector<16x16xf32>
      %77 = arith.select %75, %25, %76 : vector<16x16xi1>, vector<16x16xf32>
      %cst_30 = arith.constant dense<0.000000e+00> : vector<16xf32>
      %78 = vector.multi_reduction <add>, %77, %cst_30 [1] : vector<16x16xf32> to vector<16xf32>
      %79 = vector.shape_cast %78 : vector<16xf32> to vector<16x1xf32>
      %80 = arith.addf %72, %79 : vector<16x1xf32>
      %c0_31 = arith.constant 0 : index
      %c0_32 = arith.constant 0 : index
      %81 = vector.load %arg7[%c0_31, %c0_32] : memref<16x1xf32, #tpu.memory_space<vmem>>, vector<16x1xf32>
      tpu.vector_store %arg7[%c0_31, %c0_32], %80 {strides = array<i32>} : memref<16x1xf32, #tpu.memory_space<vmem>>, vector<16x1xf32>,
    } else {
    }
    %c16_i32_17 = arith.constant 16 : i32
    %48 = arith.addi %1, %c16_i32_17 : i32
    %49 = arith.cmpi slt, %0, %48 : i32
    %c16_i32_18 = arith.constant 16 : i32
    %50 = arith.addi %0, %c16_i32_18 : i32
    %51 = arith.cmpi slt, %1, %50 : i32
    %52 = arith.andi %49, %51 : i1
    %53 = arith.extui %52 : i1 to i32
    %c0_i32_19 = arith.constant 0 : i32
    %54 = arith.cmpi ne, %53, %c0_i32_19 : i32
    scf.if %54 {
      %61 = vector.broadcast %28 : vector<16x1xi32> to vector<16x16xi32>
      %62 = vector.broadcast %31 : vector<1x16xi32> to vector<16x16xi32>
      %63 = arith.cmpi eq, %61, %62 : vector<16x16xi32>
      %cst_23 = arith.constant 9.99999995E+11 : f32
      %64 = vector.broadcast %cst_23 : f32 to vector<16x16xf32>
      %65 = arith.subf %23, %64 : vector<16x16xf32>
      %cst_24 = arith.constant 2.000000e+01 : f32
      %66 = vector.broadcast %cst_24 : f32 to vector<16x16xf32>
      %67 = arith.mulf %65, %66 : vector<16x16xf32>
      %68 = arith.select %63, %67, %25 : vector<16x16xi1>, vector<16x16xf32>
      %c0_25 = arith.constant 0 : index
      %c0_26 = arith.constant 0 : index
      %69 = vector.load %arg5[%c0_25, %c0_26] : memref<16x1xf32, #tpu.memory_space<vmem>>, vector<16x1xf32>
      %cst_27 = arith.constant dense<0xFF800000> : vector<16xf32>
      %70 = vector.multi_reduction <maximumf>, %68, %cst_27 [1] : vector<16x16xf32> to vector<16xf32>
      %71 = vector.shape_cast %70 : vector<16xf32> to vector<16x1xf32>
      %72 = arith.maximumf %69, %71 : vector<16x1xf32>
      %73 = arith.subf %69, %72 : vector<16x1xf32>
      %74 = math.exp %73 : vector<16x1xf32>
      %c0_28 = arith.constant 0 : index
      %c0_29 = arith.constant 0 : index
      %75 = vector.load %arg6[%c0_28, %c0_29] : memref<16x1xf32, #tpu.memory_space<vmem>>, vector<16x1xf32>
      %76 = arith.mulf %74, %75 : vector<16x1xf32>
      %77 = vector.broadcast %72 : vector<16x1xf32> to vector<16x16xf32>
      %78 = arith.subf %68, %77 : vector<16x16xf32>
      %79 = math.exp %78 : vector<16x16xf32>
      %cst_30 = arith.constant dense<0.000000e+00> : vector<16xf32>
      %80 = vector.multi_reduction <add>, %79, %cst_30 [1] : vector<16x16xf32> to vector<16xf32>
      %81 = vector.shape_cast %80 : vector<16xf32> to vector<16x1xf32>
      %82 = arith.addf %76, %81 : vector<16x1xf32>
      %c0_31 = arith.constant 0 : index
      %c0_32 = arith.constant 0 : index
      %83 = vector.load %arg6[%c0_31, %c0_32] : memref<16x1xf32, #tpu.memory_space<vmem>>, vector<16x1xf32>
      tpu.vector_store %arg6[%c0_31, %c0_32], %82 {strides = array<i32>} : memref<16x1xf32, #tpu.memory_space<vmem>>, vector<16x1xf32>,
      %c0_33 = arith.constant 0 : index
      %c0_34 = arith.constant 0 : index
      %84 = vector.load %arg5[%c0_33, %c0_34] : memref<16x1xf32, #tpu.memory_space<vmem>>, vector<16x1xf32>
      tpu.vector_store %arg5[%c0_33, %c0_34], %72 {strides = array<i32>} : memref<16x1xf32, #tpu.memory_space<vmem>>, vector<16x1xf32>,
    } else {
    }
    %true = arith.constant true
    %55 = arith.xori %52, %true : i1
    %56 = arith.extui %55 : i1 to i32
    %c0_i32_20 = arith.constant 0 : i32
    %57 = arith.cmpi ne, %56, %c0_i32_20 : i32
    scf.if %57 {
      %c0_23 = arith.constant 0 : index
      %c0_24 = arith.constant 0 : index
      %61 = vector.load %arg5[%c0_23, %c0_24] : memref<16x1xf32, #tpu.memory_space<vmem>>, vector<16x1xf32>
      %cst_25 = arith.constant dense<0xFF800000> : vector<16xf32>
      %62 = vector.multi_reduction <maximumf>, %25, %cst_25 [1] : vector<16x16xf32> to vector<16xf32>
      %63 = vector.shape_cast %62 : vector<16xf32> to vector<16x1xf32>
      %64 = arith.maximumf %61, %63 : vector<16x1xf32>
      %65 = arith.subf %61, %64 : vector<16x1xf32>
      %66 = math.exp %65 : vector<16x1xf32>
      %c0_26 = arith.constant 0 : index
      %c0_27 = arith.constant 0 : index
      %67 = vector.load %arg6[%c0_26, %c0_27] : memref<16x1xf32, #tpu.memory_space<vmem>>, vector<16x1xf32>
      %68 = arith.mulf %66, %67 : vector<16x1xf32>
      %69 = vector.broadcast %64 : vector<16x1xf32> to vector<16x16xf32>
      %70 = arith.subf %25, %69 : vector<16x16xf32>
      %71 = math.exp %70 : vector<16x16xf32>
      %cst_28 = arith.constant dense<0.000000e+00> : vector<16xf32>
      %72 = vector.multi_reduction <add>, %71, %cst_28 [1] : vector<16x16xf32> to vector<16xf32>
      %73 = vector.shape_cast %72 : vector<16xf32> to vector<16x1xf32>
      %74 = arith.addf %68, %73 : vector<16x1xf32>
      %c0_29 = arith.constant 0 : index
      %c0_30 = arith.constant 0 : index
      %75 = vector.load %arg6[%c0_29, %c0_30] : memref<16x1xf32, #tpu.memory_space<vmem>>, vector<16x1xf32>
      tpu.vector_store %arg6[%c0_29, %c0_30], %74 {strides = array<i32>} : memref<16x1xf32, #tpu.memory_space<vmem>>, vector<16x1xf32>,
      %c0_31 = arith.constant 0 : index
      %c0_32 = arith.constant 0 : index
      %76 = vector.load %arg5[%c0_31, %c0_32] : memref<16x1xf32, #tpu.memory_space<vmem>>, vector<16x1xf32>
      tpu.vector_store %arg5[%c0_31, %c0_32], %64 {strides = array<i32>} : memref<16x1xf32, #tpu.memory_space<vmem>>, vector<16x1xf32>,
    } else {
    }
    %c0_i32_21 = arith.constant 0 : i32
    %58 = arith.cmpi eq, %arg1, %c0_i32_21 : i32
    %59 = arith.extui %58 : i1 to i32
    %c0_i32_22 = arith.constant 0 : i32
    %60 = arith.cmpi ne, %59, %c0_i32_22 : i32
    scf.if %60 {
      %c0_23 = arith.constant 0 : index
      %c0_24 = arith.constant 0 : index
      %61 = vector.load %arg5[%c0_23, %c0_24] : memref<16x1xf32, #tpu.memory_space<vmem>>, vector<16x1xf32>
      %c0_25 = arith.constant 0 : index
      %c0_26 = arith.constant 0 : index
      %62 = vector.load %arg6[%c0_25, %c0_26] : memref<16x1xf32, #tpu.memory_space<vmem>>, vector<16x1xf32>
      %63 = math.log %62 : vector<16x1xf32>
      %64 = arith.addf %61, %63 : vector<16x1xf32>
      %c0_27 = arith.constant 0 : index
      %c0_28 = arith.constant 0 : index
      %65 = vector.load %arg7[%c0_27, %c0_28] : memref<16x1xf32, #tpu.memory_space<vmem>>, vector<16x1xf32>
      %66 = arith.subf %64, %65 : vector<16x1xf32>
      %c0_29 = arith.constant 0 : index
      %c0_30 = arith.constant 0 : index
      %67 = vector.load %arg4[%c0_29, %c0_30] : memref<16x1xf32, #tpu.memory_space<vmem>>, vector<16x1xf32>
      tpu.vector_store %arg4[%c0_29, %c0_30], %66 {strides = array<i32>} : memref<16x1xf32, #tpu.memory_space<vmem>>, vector<16x1xf32>,
    } else {
    }
    return
  }
  func.func @transform_0(%arg0: i32, %arg1: i32) -> (i32, i32) {
    %c0_i32 = arith.constant 0 : i32
    %c0_i32_0 = arith.constant 0 : i32
    return %arg0, %c0_i32 : i32, i32
  }
  func.func @transform_1(%arg0: i32, %arg1: i32) -> (i32, i32) {
    %c0_i32 = arith.constant 0 : i32
    %c0_i32_0 = arith.constant 0 : i32
    return %arg1, %c0_i32 : i32, i32
  }
  func.func @transform_2(%arg0: i32, %arg1: i32) -> (i32, i32) {
    %c0_i32 = arith.constant 0 : i32
    %c0_i32_0 = arith.constant 0 : i32
    return %arg0, %c0_i32 : i32, i32
  }
}

</mosaic_0001>

<bundles_post_ra>
// kernel: tpu_custom_call.1
= control target key start
LH: loop header
LB: loop body
LE: loop exit
PB: predicated region body
PF: predicated region fallthrough
CT: control target
= control target key end

     0   :  { %7 = vsyncpa [#allocation6], 0  ;;  %s496_s0 = inlined_call_operand.hbm [shape: f32[16,128], index: 0, kind: input, shape index: {}]   ;;  %s497_s1 = inlined_call_operand.hbm [shape: f32[16,128], index: 1, kind: input, shape index: {}]   ;;  %s498_s2 = inlined_call_operand.vmem [shape: f32[16,1], index: 2, kind: output, shape index: {}]  }
   0x1   :  { %8 = vsyncpa [#allocation8], 0  ;;  %s441_s9 = smov [#allocation5]  }
   0x2   :  { %s14_s10 = sshll.u32 %s441_s9, 4  ;;  %s15_s10 = int_to_ptr.vmem [resolvable:$true] %s14_s10 }
   0x3   :  { %s405_s11 = scalar_lea.vmem %s15_s10, 256  ;;  %p410_p1 = scmp.lt.s32.totalorder %s15_s10, %s15_s10 }
   0x4   :  { %p406_p0 = scmp.ne.s32.totalorder %s15_s10, %s405_s11  ;;  %p411_p2 = scmp.lt.s32.totalorder %s405_s11, %s405_s11 }
   0x6   :  { %p412_p3 = por %p411_p2, %p410_p1 }
   0x8   :  { %p413_p4 = pnand %p412_p3, %p406_p0 }
   0xa   :  { %416 = shalt.err (!%p413_p4)
}
   0xb   :  { %s442_s12 = smov 128   ;;  %s443_s13 = smov 8  }
   0xc   :  { %20 = dma.hbm_to_vmem [thread:$0]  %s496_s0, 256, %s15_s10, [#allocation6], %s442_s12, %s442_s12, %s443_s13  }
   0xd   :  { %s444_s16 = smov [#allocation7]  }
   0xe   :  { %s26_s17 = sshll.u32 %s444_s16, 4  ;;  %s27_s17 = int_to_ptr.vmem [resolvable:$true] %s26_s17 }
   0xf   :  { %s425_s18 = scalar_lea.vmem %s27_s17, 256  ;;  %p430_p6 = scmp.lt.s32.totalorder %s27_s17, %s27_s17 }
  0x10   :  { %p426_p5 = scmp.ne.s32.totalorder %s27_s17, %s425_s18  ;;  %p431_p7 = scmp.lt.s32.totalorder %s425_s18, %s425_s18 }
  0x12   :  { %p432_p8 = por %p431_p7, %p430_p6 }
  0x14   :  { %p433_p9 = pnand %p432_p8, %p426_p5 }
  0x16   :  { %436 = shalt.err (!%p433_p9)
}
  0x17   :  { %32 = dma.hbm_to_vmem [thread:$0]  %s497_s1, 256, %s27_s17, [#allocation8], %s442_s12, %s442_s12, %s443_s13  }
  0x18   :  { %437 = dma.done.wait [#allocation6], 256  }
  0x19   :  { %438 = vsyncadd [#allocation6], 4294967040 }
  0x1a   :  { %439 = dma.done.wait [#allocation8], 256  }
  0x1b   :  { %440 = vsyncadd [#allocation8], 4294967040  ;;  %v55_v0 = vld [vmem:[#allocation7 + $0x8] sm:$0xff]  ;;  %v54_v1 = vld [vmem:[#allocation7] sm:$0xff]  ;;  %v157_v24 = vlaneseq  ;;  %vm45_vm4 = vcmask 7168   ;;  %v445_v36 = vmov -inf  }
  0x1c   :  { %v52_v2 = vld [vmem:[#allocation5] sm:$0xff]  ;;  %v69_v3 = vmul.f32 %v55_v0, %v55_v0  ;;  %v53_v5 = vld [vmem:[#allocation5 + $0x8] sm:$0xff]  ;;  %v68_v6 = vmul.f32 %v54_v1, %v54_v1  ;;  %47 = vst.msk [vmem:[#allocation2 + $0x8] sm:$0xff] %vm45_vm4, %v445_v36  ;;  %46 = vst.msk [vmem:[#allocation2] sm:$0xff] %vm45_vm4, %v445_v36  ;;  %vm199_vm7 = vcmask 130048   ;;  %v446_v51 = vmov 0  }
  0x1d   :  { %v56_v4 = vmul.f32 %v52_v2, %v52_v2  ;;  %v57_v7 = vmul.f32 %v53_v5, %v53_v5  ;;  %v158_v25 = vshrl.u32 %v157_v24, 7  ;;  %v164_v31 = vand.u32 127, %v157_v24  ;;  %376 = vset.pattern.permute.xlu1 %v446_v51  ;;  %375 = vset.pattern.permute.xlu0 %v446_v51 }
  0x1e   :  { %72 = vadd.xlane.f32.xlu0 %v69_v3  ;;  %v447_v52 = vmov 0.0  }
  0x1f   :  { %58 = vadd.xlane.f32.xlu1 %v56_v4  ;;  %v159_v26 = vadd.s32 8, %v158_v25  ;;  %v187_v29 = vshra.s32 %v158_v25, 1  ;;  %v183_v32 = vand.u32 1, %v158_v25  ;;  %vm218_vm6 = vcmp.eq.s32.totalorder %v158_v25, %v164_v31  ;;  %49 = vst.msk [vmem:[#allocation3 + $0x8] sm:$0xff] %vm45_vm4, %v447_v52  ;;  %48 = vst.msk [vmem:[#allocation3] sm:$0xff] %vm45_vm4, %v447_v52 }
  0x20   :  { %50 = vst.msk [vmem:[#allocation4] sm:$0xff] %vm45_vm4, %v447_v52  ;;  %51 = vst.msk [vmem:[#allocation4 + $0x8] sm:$0xff] %vm45_vm4, %v447_v52 }
  0x21   :  { %v188_v27 = vshra.s32 %v159_v26, 1  ;;  %v184_v28 = vand.u32 1, %v159_v26  ;;  %v189_v33 = vadd.s32 8, %v187_v29  ;;  %vm185_vm1 = vcmp.eq.s32.totalorder %v183_v32, 0 }
  0x22   :  { %70 = vadd.xlane.f32.xlu0 %v68_v6  ;;  %vm219_vm5 = vcmp.eq.s32.totalorder %v159_v26, %v164_v31 }
  0x23   :  { %60 = vadd.xlane.f32.xlu1 %v57_v7  ;;  %v190_v30 = vadd.s32 8, %v188_v27  ;;  %vm186_vm0 = vcmp.eq.s32.totalorder %v184_v28, 0  ;;  %v191_v35 = vsel %vm185_vm1, %v189_v33, %v187_v29  ;;  %v227_v53 = vld [vmem:[#allocation2 + $0x8] sm:$0xff]  ;;  %v226_v55 = vld [vmem:[#allocation2] sm:$0xff] }
  0x24   :  { %vm195_vm3 = vcmp.eq.s32.totalorder %v164_v31, %v191_v35 }
  0x25   :  { %v192_v34 = vsel %vm186_vm0, %v190_v30, %v188_v27 }
  0x26   :  { %vm196_vm2 = vcmp.eq.s32.totalorder %v164_v31, %v192_v34 }
  0x27   :  { %v194_v24 = vld [vmem:[#allocation4 + $0x8] sm:$0xff] }
  0xa7   :  { %v73_v8 = vpop.xlane.xlu0 %72 }
  0xa8   :  { %v59_v9 = vpop.xlane.xlu1 %58  ;;  %v75_v10 = vmax.f32 %v73_v8, 1e-24 }
  0xa9   :  { %v62_v11 = vmax.f32 %v59_v9, 1e-24 }
  0xaa   :  { %377 = vrsqrt.f32 %v75_v10 }
  0xab   :  { %v71_v12 = vpop.xlane.xlu0 %70  ;;  %379 = vrsqrt.f32 %v62_v11 }
  0xac   :  { %v61_v13 = vpop.xlane.xlu1 %60  ;;  %v74_v14 = vmax.f32 %v71_v12, 1e-24  ;;  %v244_v12 = vld [vmem:[#allocation3 + $0x8] sm:$0xff] }
  0xad   :  { %v63_v15 = vmax.f32 %v61_v13, 1e-24 }
  0xae   :  { %381 = vrsqrt.f32 %v74_v14  ;;  %v243_v14 = vld [vmem:[#allocation3] sm:$0xff] }
  0xaf   :  { %383 = vrsqrt.f32 %v63_v15 }
  0xb7   :  { %v378_v16 = vpop.eup %377 }
  0xb8   :  { %v380_v17 = vpop.eup %379  ;;  %v79_v18 = vmul.f32 %v378_v16, %v55_v0 }
  0xb9   :  { %v66_v19 = vmul.f32 %v380_v17, %v52_v2 }
  0xba   :  { %361 = vmatprep.subr.mxu0 %v79_v18 }
  0xbb   :  { %v382_v20 = vpop.eup %381  ;;  %362 = vmatpush3.xpose.msra.mxu0 %v79_v18  ;;  %365 = vmatprep.mubr.f32.mxu0 %v66_v19 }
  0xbc   :  { %v384_v21 = vpop.eup %383  ;;  %v78_v22 = vmul.f32 %v382_v20, %v54_v1 }
  0xbd   :  { %v67_v23 = vmul.f32 %v384_v21, %v53_v5  ;;  %v193_v21 = vld [vmem:[#allocation4] sm:$0xff] }
  0xbe   :  { %363 = vmatprep.subr.mxu0 %v78_v22 }
  0xbf   :  { %364 = vmatpush3.xpose.msra.mxu0 %v78_v22 }
  0xc2   :  { %366 = vmatmul.mubr.f32.vlgmr.msra.gmra.mxu0 %v67_v23 }
 0x182   :  { %v367_v37 = vpop.f32.mrf.mxu0 }
 0x183   :  { %v156_v38 = vmul.f32 20.0, %v367_v37  ;;  %v356_v39 = vadd.f32 -1e+12, %v367_v37 }
 0x184   :  { %v146_v40 = vpop.f32.mrf.mxu0 }
 0x185   :  { %v223_v41 = vmul.f32 20.0, %v356_v39  ;;  %v155_v42 = vmul.f32 20.0, %v146_v40  ;;  %v355_v43 = vadd.f32 -1e+12, %v146_v40  ;;  %v198_v44 = vsel %vm196_vm2, %v156_v38, 0.0 }
 0x186   :  { %v203_v8 = vsel %vm199_vm7, %v198_v44, 0.0 }
 0x187   :  { %v222_v45 = vmul.f32 20.0, %v355_v43  ;;  %v225_v46 = vsel %vm219_vm5, %v223_v41, %v156_v38  ;;  %v197_v47 = vsel %vm195_vm3, %v155_v42, 0.0 }
 0x188   :  { %v232_v48 = vsel %vm199_vm7, %v225_v46, -inf  ;;  %v200_v7 = vsel %vm199_vm7, %v197_v47, 0.0 }
 0x189   :  { %233 = vmax.xlane.f32.xlu1 %v232_v48  ;;  %v224_v49 = vsel %vm218_vm6, %v222_v45, %v155_v42 }
 0x18a   :  { %v229_v50 = vsel %vm199_vm7, %v224_v49, -inf }
 0x18b   :  { %230 = vmax.xlane.f32.xlu0 %v229_v50 }
 0x212   :  { %v234_v54 = vpop.xlane.xlu1 %233 }
 0x213   :  { %v236_v56 = vmax.f32 %v227_v53, %v234_v54 }
 0x214   :  { %v231_v57 = vpop.xlane.xlu0 %230 }
 0x215   :  { %v238_v58 = vsub.f32 %v227_v53, %v236_v56  ;;  %275 = vst.msk [vmem:[#allocation2 + $0x8] sm:$0xff] %vm45_vm4, %v236_v56  ;;  %v235_v59 = vmax.f32 %v226_v55, %v231_v57  ;;  %254 = vperm.xlu1 %376, %v236_v56  }
 0x217   :  { %v237_v60 = vsub.f32 %v226_v55, %v235_v59  ;;  %274 = vst.msk [vmem:[#allocation2] sm:$0xff] %vm45_vm4, %v235_v59  ;;  %249 = vperm.xlu0 %375, %v235_v59   ;;  %v241_v9 = vmul.f32 1.442695, %v238_v58 }
 0x219   :  { %v239_v10 = vmul.f32 1.442695, %v237_v60 }
 0x21c   :  { %v333_v32 = vld [vmem:[#allocation2 + $0x8] sm:$0xff] }
 0x21e   :  { %v332_v35 = vld [vmem:[#allocation2] sm:$0xff] }
 0x290   :  { %v255_v61 = vpop.permute.xlu1 %254 }
 0x291   :  { %v258_v62 = vsub.f32 %v225_v46, %v255_v61 }
 0x292   :  { %v250_v63 = vpop.permute.xlu0 %249 }
 0x293   :  { %v261_v0 = vmul.f32 1.442695, %v258_v62  ;;  %v257_v1 = vsub.f32 %v224_v49, %v250_v63 }
 0x295   :  { %385 = vpow2.f32 %v261_v0  ;;  %v259_v2 = vmul.f32 1.442695, %v257_v1 }
 0x297   :  { %387 = vpow2.f32 %v259_v2 }
 0x298   :  { %389 = vpow2.f32 %v241_v9 }
 0x299   :  { %391 = vpow2.f32 %v239_v10 }
 0x2a2   :  { %v386_v3 = vpop.eup %385 }
 0x2a3   :  { %v266_v4 = vsel %vm199_vm7, %v386_v3, 0.0 }
 0x2a4   :  { %v388_v5 = vpop.eup %387  ;;  %267 = vadd.xlane.f32.xlu0 %v266_v4 }
 0x2a5   :  { %v263_v6 = vsel %vm199_vm7, %v388_v5, 0.0  ;;  %v390_v11 = vpop.eup %389 }
 0x2a6   :  { %264 = vadd.xlane.f32.xlu1 %v263_v6  ;;  %v392_v13 = vpop.eup %391  ;;  %v246_v15 = vmul.f32 %v390_v11, %v244_v12 }
 0x2a7   :  { %v245_v18 = vmul.f32 %v392_v13, %v243_v14 }
 0x2aa   :  { %201 = vadd.xlane.f32.xlu1 %v200_v7 }
 0x2ae   :  { %204 = vadd.xlane.f32.xlu1 %v203_v8 }
 0x32d   :  { %v268_v16 = vpop.xlane.xlu0 %267 }
 0x32e   :  { %v270_v17 = vadd.f32 %v268_v16, %v246_v15 }
 0x32f   :  { %v265_v19 = vpop.xlane.xlu1 %264 }
 0x330   :  { %273 = vst.msk [vmem:[#allocation3 + $0x8] sm:$0xff] %vm45_vm4, %v270_v17  ;;  %v269_v20 = vadd.f32 %v265_v19, %v245_v18 }
 0x332   :  { %272 = vst.msk [vmem:[#allocation3] sm:$0xff] %vm45_vm4, %v269_v20 }
 0x333   :  { %v202_v22 = vpop.xlane.xlu1 %201 }
 0x334   :  { %v206_v23 = vadd.f32 %v202_v22, %v193_v21 }
 0x336   :  { %209 = vst.msk [vmem:[#allocation4] sm:$0xff] %vm45_vm4, %v206_v23 }
 0x337   :  { %v335_v25 = vld [vmem:[#allocation3 + $0x8] sm:$0xff]  ;;  %v205_v26 = vpop.xlane.xlu1 %204 }
 0x338   :  { %393 = vlog2.f32 %v335_v25  ;;  %v207_v27 = vadd.f32 %v205_v26, %v194_v24 }
 0x339   :  { %v334_v28 = vld [vmem:[#allocation3] sm:$0xff] }
 0x33a   :  { %395 = vlog2.f32 %v334_v28  ;;  %210 = vst.msk [vmem:[#allocation4 + $0x8] sm:$0xff] %vm45_vm4, %v207_v27 }
 0x33d   :  { %v342_v39 = vld [vmem:[#allocation4] sm:$0xff] }
 0x341   :  { %v343_v36 = vld [vmem:[#allocation4 + $0x8] sm:$0xff] }
 0x345   :  { %v394_v29 = vpop.eup %393 }
 0x346   :  { %v339_v30 = vmul.f32 0.6931472, %v394_v29 }
 0x347   :  { %v396_v31 = vpop.eup %395 }
 0x348   :  { %v337_v33 = vmul.f32 0.6931472, %v396_v31  ;;  %v341_v34 = vadd.f32 %v339_v30, %v333_v32 }
 0x34a   :  { %v340_v37 = vadd.f32 %v337_v33, %v332_v35  ;;  %v345_v38 = vsub.f32 %v341_v34, %v343_v36 }
 0x34c   :  { %v344_v40 = vsub.f32 %v340_v37, %v342_v39  ;;  %348 = vst.msk [vmem:[%s498_s2 + $0x8] sm:$0xff] %vm45_vm4, %v345_v38 }
 0x34e   :  { %347 = vst.msk [vmem:[%s498_s2] sm:$0xff] %vm45_vm4, %v344_v40 }
 0x34f   :  { %353 = vsyncpa [#allocation6], 1 }
 0x350   :  { %354 = vsyncpa [#allocation8], 1 }

</bundles_post_ra>
